<compile_context>
chip_gen: v7x
topology: tpu7x:2x2x1
jax: 0.10.0
libtpu: 0.0.40
codegen_flags: <defaults>
</compile_context>

<pallas_src>
import functools

import jax
import jax.numpy as jnp
from jax import lax
from jax.experimental import pallas as pl
from jax.experimental.pallas import tpu as pltpu


def _mlp_kernel(*refs, num_hidden, bn_eps):
    """refs = (x_ref, <per-hidden-layer: w,b,gamma,beta,mean,var>, w_last, b_last, out_ref)."""
    x_ref = refs[0]
    out_ref = refs[-1]
    p = refs[1:-1]

    h = x_ref[...].astype(jnp.float32)

    idx = 0
    for _ in range(num_hidden):
        w = p[idx + 0][...].astype(jnp.float32)
        b = p[idx + 1][...].astype(jnp.float32)
        gamma = p[idx + 2][...].astype(jnp.float32)
        beta = p[idx + 3][...].astype(jnp.float32)
        mean = p[idx + 4][...].astype(jnp.float32)
        var = p[idx + 5][...].astype(jnp.float32)
        idx += 6

        # Linear (MXU, f32 accumulation)
        h = jnp.dot(h, w, preferred_element_type=jnp.float32) + b

        # BatchNorm1d (eval: running stats) folded into one scale/shift,
        # fused with ReLU.  Dropout(p=0.25) is identity in eval mode.
        scale = gamma * lax.rsqrt(var + bn_eps)
        shift = beta - mean * scale
        h = jnp.maximum(h * scale + shift, 0.0)

    # Final Linear + Sigmoid
    w = p[idx + 0][...].astype(jnp.float32)
    b = p[idx + 1][...].astype(jnp.float32)
    h = jnp.dot(h, w, preferred_element_type=jnp.float32) + b
    out_ref[...] = jax.nn.sigmoid(h).astype(out_ref.dtype)


def mlp_forward(x, layer_params, *, bn_eps=1e-5, tile_b=None):
    """Pallas TPU forward of MLPClassifier (eval mode).

    layer_params: list of tuples; hidden layers are (w, b, gamma, beta,
    running_mean, running_var), the final layer is (w, b).  Weights are
    stored [in, out] (PyTorch weight transposed); all vectors are [1, out].
    """
    B, d_in = x.shape
    num_hidden = len(layer_params) - 1
    d_out = layer_params[-1][0].shape[1]

    flat = [a for layer in layer_params for a in layer]

    if tile_b is None:
        # Small batches: single block.  Large batches: 256-row tiles keep VMEM
        # (incl. v7x's 64 MiB) comfortable while amortizing per-step overhead.
        tile_b = B if B <= 256 else 256
    assert B % tile_b == 0, "batch must be divisible by the batch tile"
    grid = (B // tile_b,)

    in_specs = [pl.BlockSpec((tile_b, d_in), lambda i: (i, 0))]
    for a in flat:
        # Full-extent parameter blocks; same block every grid step.
        in_specs.append(pl.BlockSpec(a.shape, lambda i: (0, 0)))

    kernel = functools.partial(_mlp_kernel, num_hidden=num_hidden, bn_eps=bn_eps)
    return pl.pallas_call(
        kernel,
        out_shape=jax.ShapeDtypeStruct((B, d_out), jnp.float32),
        grid=grid,
        in_specs=in_specs,
        out_specs=pl.BlockSpec((tile_b, d_out), lambda i: (i, 0)),
        compiler_params=pltpu.CompilerParams(dimension_semantics=("parallel",)),
    )(x, *flat)


def _mlp_forward_ref(x, layer_params, bn_eps=1e-5):
    """Pure-JAX reference mirroring the PyTorch eval-mode forward."""
    h = x.astype(jnp.float32)
    for w, b, gamma, beta, mean, var in layer_params[:-1]:
        h = h @ w + b
        h = (h - mean) / jnp.sqrt(var + bn_eps) * gamma + beta
        h = jnp.maximum(h, 0.0)  # ReLU; Dropout is identity in eval mode
    w, b = layer_params[-1]
    return jax.nn.sigmoid(h @ w + b)


if __name__ == "__main__":
    key = jax.random.PRNGKey(0)
    keys = iter(jax.random.split(key, 64))

    layer_sizes = [16, 32, 32, 8]   # MLPClassifier(layer_sizes)
    B = 16

    x = jax.random.normal(next(keys), (B, layer_sizes[0]), jnp.float32)

    layer_params = []
    n_layers = len(layer_sizes) - 1
    for i in range(n_layers):
        din, dout = layer_sizes[i], layer_sizes[i + 1]
        w = jax.random.normal(next(keys), (din, dout), jnp.float32) / jnp.sqrt(
            jnp.float32(din))
        b = jax.random.normal(next(keys), (1, dout), jnp.float32) * 0.1
        if i < n_layers - 1:
            gamma = jax.random.uniform(next(keys), (1, dout), jnp.float32, minval=0.5, maxval=1.5)
            beta = jax.random.normal(next(keys), (1, dout), jnp.float32) * 0.1
            rmean = jax.random.normal(next(keys), (1, dout), jnp.float32) * 0.5
            rvar = jax.random.uniform(next(keys), (1, dout), jnp.float32, minval=0.5, maxval=2.0)
            layer_params.append((w, b, gamma, beta, rmean, rvar))
        else:
            layer_params.append((w, b))

    out = mlp_forward(x, layer_params)
    jax.block_until_ready(out)

    ref = _mlp_forward_ref(x, layer_params)
    assert out.shape == (B, layer_sizes[-1])
    assert jnp.allclose(out, ref, rtol=1e-5, atol=1e-5), (out, ref)

    print("KERNEL_OK")
</pallas_src>

<mosaic_0001>
module attributes {stable_mosaic.version = 11 : i64} {
  func.func @_mlp_kernel(%arg0: i32, %arg1: memref<16x16xf32, #tpu.memory_space<vmem>>, %arg2: memref<16x32xf32, #tpu.memory_space<vmem>>, %arg3: memref<1x32xf32, #tpu.memory_space<vmem>>, %arg4: memref<1x32xf32, #tpu.memory_space<vmem>>, %arg5: memref<1x32xf32, #tpu.memory_space<vmem>>, %arg6: memref<1x32xf32, #tpu.memory_space<vmem>>, %arg7: memref<1x32xf32, #tpu.memory_space<vmem>>, %arg8: memref<32x32xf32, #tpu.memory_space<vmem>>, %arg9: memref<1x32xf32, #tpu.memory_space<vmem>>, %arg10: memref<1x32xf32, #tpu.memory_space<vmem>>, %arg11: memref<1x32xf32, #tpu.memory_space<vmem>>, %arg12: memref<1x32xf32, #tpu.memory_space<vmem>>, %arg13: memref<1x32xf32, #tpu.memory_space<vmem>>, %arg14: memref<32x8xf32, #tpu.memory_space<vmem>>, %arg15: memref<1x8xf32, #tpu.memory_space<vmem>>, %arg16: memref<16x8xf32, #tpu.memory_space<vmem>>) attributes {dimension_semantics = [#tpu.dimension_semantics<parallel>], iteration_bounds = array<i64: 1>, scalar_prefetch = 0 : i64, scratch_operands = 0 : i64, tpu.core_type = #tpu.core_type<tc>, window_params = [{transform_indices = @transform_0, window_bounds = array<i64: 16, 16>}, {pipeline_mode = #tpu.pipeline_mode<synchronous>, transform_indices = @transform_1, window_bounds = array<i64: 16, 32>}, {pipeline_mode = #tpu.pipeline_mode<synchronous>, transform_indices = @transform_2, window_bounds = array<i64: 1, 32>}, {pipeline_mode = #tpu.pipeline_mode<synchronous>, transform_indices = @transform_3, window_bounds = array<i64: 1, 32>}, {pipeline_mode = #tpu.pipeline_mode<synchronous>, transform_indices = @transform_4, window_bounds = array<i64: 1, 32>}, {pipeline_mode = #tpu.pipeline_mode<synchronous>, transform_indices = @transform_5, window_bounds = array<i64: 1, 32>}, {pipeline_mode = #tpu.pipeline_mode<synchronous>, transform_indices = @transform_6, window_bounds = array<i64: 1, 32>}, {pipeline_mode = #tpu.pipeline_mode<synchronous>, transform_indices = @transform_7, window_bounds = array<i64: 32, 32>}, {pipeline_mode = #tpu.pipeline_mode<synchronous>, transform_indices = @transform_8, window_bounds = array<i64: 1, 32>}, {pipeline_mode = #tpu.pipeline_mode<synchronous>, transform_indices = @transform_9, window_bounds = array<i64: 1, 32>}, {pipeline_mode = #tpu.pipeline_mode<synchronous>, transform_indices = @transform_10, window_bounds = array<i64: 1, 32>}, {pipeline_mode = #tpu.pipeline_mode<synchronous>, transform_indices = @transform_11, window_bounds = array<i64: 1, 32>}, {pipeline_mode = #tpu.pipeline_mode<synchronous>, transform_indices = @transform_12, window_bounds = array<i64: 1, 32>}, {pipeline_mode = #tpu.pipeline_mode<synchronous>, transform_indices = @transform_13, window_bounds = array<i64: 32, 8>}, {pipeline_mode = #tpu.pipeline_mode<synchronous>, transform_indices = @transform_14, window_bounds = array<i64: 1, 8>}, {transform_indices = @transform_15, window_bounds = array<i64: 16, 8>}]} {
    %c0 = arith.constant 0 : index
    %c0_0 = arith.constant 0 : index
    %0 = vector.load %arg1[%c0, %c0_0] : memref<16x16xf32, #tpu.memory_space<vmem>>, vector<16x16xf32>
    %c0_1 = arith.constant 0 : index
    %c0_2 = arith.constant 0 : index
    %1 = vector.load %arg2[%c0_1, %c0_2] : memref<16x32xf32, #tpu.memory_space<vmem>>, vector<16x32xf32>
    %c0_3 = arith.constant 0 : index
    %c0_4 = arith.constant 0 : index
    %2 = vector.load %arg3[%c0_3, %c0_4] : memref<1x32xf32, #tpu.memory_space<vmem>>, vector<1x32xf32>
    %c0_5 = arith.constant 0 : index
    %c0_6 = arith.constant 0 : index
    %3 = vector.load %arg4[%c0_5, %c0_6] : memref<1x32xf32, #tpu.memory_space<vmem>>, vector<1x32xf32>
    %c0_7 = arith.constant 0 : index
    %c0_8 = arith.constant 0 : index
    %4 = vector.load %arg5[%c0_7, %c0_8] : memref<1x32xf32, #tpu.memory_space<vmem>>, vector<1x32xf32>
    %c0_9 = arith.constant 0 : index
    %c0_10 = arith.constant 0 : index
    %5 = vector.load %arg6[%c0_9, %c0_10] : memref<1x32xf32, #tpu.memory_space<vmem>>, vector<1x32xf32>
    %c0_11 = arith.constant 0 : index
    %c0_12 = arith.constant 0 : index
    %6 = vector.load %arg7[%c0_11, %c0_12] : memref<1x32xf32, #tpu.memory_space<vmem>>, vector<1x32xf32>
    %cst = arith.constant dense<0.000000e+00> : vector<16x32xf32>
    %7 = tpu.matmul %0, %1, %cst {dimension_numbers = #tpu.dot_dimension_numbers<[1], [0], [0], [1], [0, 0, 1, 1], [], []>} : vector<16x16xf32>, vector<16x32xf32>, vector<16x32xf32> -> vector<16x32xf32>
    %8 = vector.broadcast %2 : vector<1x32xf32> to vector<16x32xf32>
    %9 = arith.addf %7, %8 : vector<16x32xf32>
    %cst_13 = arith.constant 9.99999974E-6 : f32
    %10 = vector.broadcast %cst_13 : f32 to vector<1x32xf32>
    %11 = arith.addf %6, %10 : vector<1x32xf32>
    %12 = math.rsqrt %11 : vector<1x32xf32>
    %13 = arith.mulf %3, %12 : vector<1x32xf32>
    %14 = arith.mulf %5, %13 : vector<1x32xf32>
    %15 = arith.subf %4, %14 : vector<1x32xf32>
    %16 = vector.broadcast %13 : vector<1x32xf32> to vector<16x32xf32>
    %17 = arith.mulf %9, %16 : vector<16x32xf32>
    %18 = vector.broadcast %15 : vector<1x32xf32> to vector<16x32xf32>
    %19 = arith.addf %17, %18 : vector<16x32xf32>
    %cst_14 = arith.constant 0.000000e+00 : f32
    %20 = vector.broadcast %cst_14 : f32 to vector<16x32xf32>
    %21 = arith.maximumf %19, %20 : vector<16x32xf32>
    %c0_15 = arith.constant 0 : index
    %c0_16 = arith.constant 0 : index
    %22 = vector.load %arg8[%c0_15, %c0_16] : memref<32x32xf32, #tpu.memory_space<vmem>>, vector<32x32xf32>
    %c0_17 = arith.constant 0 : index
    %c0_18 = arith.constant 0 : index
    %23 = vector.load %arg9[%c0_17, %c0_18] : memref<1x32xf32, #tpu.memory_space<vmem>>, vector<1x32xf32>
    %c0_19 = arith.constant 0 : index
    %c0_20 = arith.constant 0 : index
    %24 = vector.load %arg10[%c0_19, %c0_20] : memref<1x32xf32, #tpu.memory_space<vmem>>, vector<1x32xf32>
    %c0_21 = arith.constant 0 : index
    %c0_22 = arith.constant 0 : index
    %25 = vector.load %arg11[%c0_21, %c0_22] : memref<1x32xf32, #tpu.memory_space<vmem>>, vector<1x32xf32>
    %c0_23 = arith.constant 0 : index
    %c0_24 = arith.constant 0 : index
    %26 = vector.load %arg12[%c0_23, %c0_24] : memref<1x32xf32, #tpu.memory_space<vmem>>, vector<1x32xf32>
    %c0_25 = arith.constant 0 : index
    %c0_26 = arith.constant 0 : index
    %27 = vector.load %arg13[%c0_25, %c0_26] : memref<1x32xf32, #tpu.memory_space<vmem>>, vector<1x32xf32>
    %cst_27 = arith.constant dense<0.000000e+00> : vector<16x32xf32>
    %28 = tpu.matmul %21, %22, %cst_27 {dimension_numbers = #tpu.dot_dimension_numbers<[1], [0], [0], [1], [0, 0, 1, 1], [], []>} : vector<16x32xf32>, vector<32x32xf32>, vector<16x32xf32> -> vector<16x32xf32>
    %29 = vector.broadcast %23 : vector<1x32xf32> to vector<16x32xf32>
    %30 = arith.addf %28, %29 : vector<16x32xf32>
    %cst_28 = arith.constant 9.99999974E-6 : f32
    %31 = vector.broadcast %cst_28 : f32 to vector<1x32xf32>
    %32 = arith.addf %27, %31 : vector<1x32xf32>
    %33 = math.rsqrt %32 : vector<1x32xf32>
    %34 = arith.mulf %24, %33 : vector<1x32xf32>
    %35 = arith.mulf %26, %34 : vector<1x32xf32>
    %36 = arith.subf %25, %35 : vector<1x32xf32>
    %37 = vector.broadcast %34 : vector<1x32xf32> to vector<16x32xf32>
    %38 = arith.mulf %30, %37 : vector<16x32xf32>
    %39 = vector.broadcast %36 : vector<1x32xf32> to vector<16x32xf32>
    %40 = arith.addf %38, %39 : vector<16x32xf32>
    %cst_29 = arith.constant 0.000000e+00 : f32
    %41 = vector.broadcast %cst_29 : f32 to vector<16x32xf32>
    %42 = arith.maximumf %40, %41 : vector<16x32xf32>
    %c0_30 = arith.constant 0 : index
    %c0_31 = arith.constant 0 : index
    %43 = vector.load %arg14[%c0_30, %c0_31] : memref<32x8xf32, #tpu.memory_space<vmem>>, vector<32x8xf32>
    %c0_32 = arith.constant 0 : index
    %c0_33 = arith.constant 0 : index
    %44 = vector.load %arg15[%c0_32, %c0_33] : memref<1x8xf32, #tpu.memory_space<vmem>>, vector<1x8xf32>
    %cst_34 = arith.constant dense<0.000000e+00> : vector<16x8xf32>
    %45 = tpu.matmul %42, %43, %cst_34 {dimension_numbers = #tpu.dot_dimension_numbers<[1], [0], [0], [1], [0, 0, 1, 1], [], []>} : vector<16x32xf32>, vector<32x8xf32>, vector<16x8xf32> -> vector<16x8xf32>
    %46 = vector.broadcast %44 : vector<1x8xf32> to vector<16x8xf32>
    %47 = arith.addf %45, %46 : vector<16x8xf32>
    %48 = arith.negf %47 : vector<16x8xf32>
    %49 = math.exp %48 : vector<16x8xf32>
    %cst_35 = arith.constant 1.000000e+00 : f32
    %50 = vector.broadcast %cst_35 : f32 to vector<16x8xf32>
    %51 = arith.addf %50, %49 : vector<16x8xf32>
    %52 = arith.divf %50, %51 : vector<16x8xf32>
    %c0_36 = arith.constant 0 : index
    %c0_37 = arith.constant 0 : index
    %53 = vector.load %arg16[%c0_36, %c0_37] : memref<16x8xf32, #tpu.memory_space<vmem>>, vector<16x8xf32>
    tpu.vector_store %arg16[%c0_36, %c0_37], %52 {strides = array<i32>} : memref<16x8xf32, #tpu.memory_space<vmem>>, vector<16x8xf32>,
    return
  }
  func.func @transform_0(%arg0: i32) -> (i32, i32) {
    %c0_i32 = arith.constant 0 : i32
    %c0_i32_0 = arith.constant 0 : i32
    return %arg0, %c0_i32 : i32, i32
  }
  func.func @transform_1(%arg0: i32) -> (i32, i32) {
    %c0_i32 = arith.constant 0 : i32
    %c0_i32_0 = arith.constant 0 : i32
    %c0_i32_1 = arith.constant 0 : i32
    return %c0_i32, %c0_i32_0 : i32, i32
  }
  func.func @transform_2(%arg0: i32) -> (i32, i32) {
    %c0_i32 = arith.constant 0 : i32
    %c0_i32_0 = arith.constant 0 : i32
    %c0_i32_1 = arith.constant 0 : i32
    return %c0_i32, %c0_i32_0 : i32, i32
  }
  func.func @transform_3(%arg0: i32) -> (i32, i32) {
    %c0_i32 = arith.constant 0 : i32
    %c0_i32_0 = arith.constant 0 : i32
    %c0_i32_1 = arith.constant 0 : i32
    return %c0_i32, %c0_i32_0 : i32, i32
  }
  func.func @transform_4(%arg0: i32) -> (i32, i32) {
    %c0_i32 = arith.constant 0 : i32
    %c0_i32_0 = arith.constant 0 : i32
    %c0_i32_1 = arith.constant 0 : i32
    return %c0_i32, %c0_i32_0 : i32, i32
  }
  func.func @transform_5(%arg0: i32) -> (i32, i32) {
    %c0_i32 = arith.constant 0 : i32
    %c0_i32_0 = arith.constant 0 : i32
    %c0_i32_1 = arith.constant 0 : i32
    return %c0_i32, %c0_i32_0 : i32, i32
  }
  func.func @transform_6(%arg0: i32) -> (i32, i32) {
    %c0_i32 = arith.constant 0 : i32
    %c0_i32_0 = arith.constant 0 : i32
    %c0_i32_1 = arith.constant 0 : i32
    return %c0_i32, %c0_i32_0 : i32, i32
  }
  func.func @transform_7(%arg0: i32) -> (i32, i32) {
    %c0_i32 = arith.constant 0 : i32
    %c0_i32_0 = arith.constant 0 : i32
    %c0_i32_1 = arith.constant 0 : i32
    return %c0_i32, %c0_i32_0 : i32, i32
  }
  func.func @transform_8(%arg0: i32) -> (i32, i32) {
    %c0_i32 = arith.constant 0 : i32
    %c0_i32_0 = arith.constant 0 : i32
    %c0_i32_1 = arith.constant 0 : i32
    return %c0_i32, %c0_i32_0 : i32, i32
  }
  func.func @transform_9(%arg0: i32) -> (i32, i32) {
    %c0_i32 = arith.constant 0 : i32
    %c0_i32_0 = arith.constant 0 : i32
    %c0_i32_1 = arith.constant 0 : i32
    return %c0_i32, %c0_i32_0 : i32, i32
  }
  func.func @transform_10(%arg0: i32) -> (i32, i32) {
    %c0_i32 = arith.constant 0 : i32
    %c0_i32_0 = arith.constant 0 : i32
    %c0_i32_1 = arith.constant 0 : i32
    return %c0_i32, %c0_i32_0 : i32, i32
  }
  func.func @transform_11(%arg0: i32) -> (i32, i32) {
    %c0_i32 = arith.constant 0 : i32
    %c0_i32_0 = arith.constant 0 : i32
    %c0_i32_1 = arith.constant 0 : i32
    return %c0_i32, %c0_i32_0 : i32, i32
  }
  func.func @transform_12(%arg0: i32) -> (i32, i32) {
    %c0_i32 = arith.constant 0 : i32
    %c0_i32_0 = arith.constant 0 : i32
    %c0_i32_1 = arith.constant 0 : i32
    return %c0_i32, %c0_i32_0 : i32, i32
  }
  func.func @transform_13(%arg0: i32) -> (i32, i32) {
    %c0_i32 = arith.constant 0 : i32
    %c0_i32_0 = arith.constant 0 : i32
    %c0_i32_1 = arith.constant 0 : i32
    return %c0_i32, %c0_i32_0 : i32, i32
  }
  func.func @transform_14(%arg0: i32) -> (i32, i32) {
    %c0_i32 = arith.constant 0 : i32
    %c0_i32_0 = arith.constant 0 : i32
    %c0_i32_1 = arith.constant 0 : i32
    return %c0_i32, %c0_i32_0 : i32, i32
  }
  func.func @transform_15(%arg0: i32) -> (i32, i32) {
    %c0_i32 = arith.constant 0 : i32
    %c0_i32_0 = arith.constant 0 : i32
    return %arg0, %c0_i32 : i32, i32
  }
}

</mosaic_0001>

<bundles_post_ra>
// kernel: tpu_custom_call.1
= control target key start
LH: loop header
LB: loop body
LE: loop exit
PB: predicated region body
PF: predicated region fallthrough
CT: control target
= control target key end

     0   :  { %20 = vsyncpa [#allocation3], 0  ;;  %s531_s18 = smov [#allocation2]   ;;  %s699_s0 = inlined_call_operand.vmem [shape: f32[16,16], index: 0, kind: input, shape index: {}]   ;;  %s700_s1 = inlined_call_operand.hbm [shape: f32[16,32], index: 1, kind: input, shape index: {}]   ;;  %s701_s2 = inlined_call_operand.vmem [shape: f32[1,32], index: 2, kind: input, shape index: {}]   ;;  %s702_s3 = inlined_call_operand.vmem [shape: f32[1,32], index: 3, kind: input, shape index: {}]   ;;  %s703_s4 = inlined_call_operand.vmem [shape: f32[1,32], index: 4, kind: input, shape index: {}]   ;;  %s704_s5 = inlined_call_operand.vmem [shape: f32[1,32], index: 5, kind: input, shape index: {}]   ;;  %s705_s6 = inlined_call_operand.vmem [shape: f32[1,32], index: 6, kind: input, shape index: {}]   ;;  %s706_s7 = inlined_call_operand.vmem [shape: f32[32,32], index: 7, kind: input, shape index: {}]   ;;  %s707_s8 = inlined_call_operand.vmem [shape: f32[1,32], index: 8, kind: input, shape index: {}]   ;;  %s708_s9 = inlined_call_operand.vmem [shape: f32[1,32], index: 9, kind: input, shape index: {}]   ;;  %s709_s10 = inlined_call_operand.vmem [shape: f32[1,32], index: 10, kind: input, shape index: {}]   ;;  %s710_s11 = inlined_call_operand.vmem [shape: f32[1,32], index: 11, kind: input, shape index: {}]   ;;  %s711_s12 = inlined_call_operand.vmem [shape: f32[1,32], index: 12, kind: input, shape index: {}]   ;;  %s712_s13 = inlined_call_operand.vmem [shape: f32[32,8], index: 13, kind: input, shape index: {}]   ;;  %s713_s14 = inlined_call_operand.vmem [shape: f32[1,8], index: 14, kind: input, shape index: {}]   ;;  %s714_s15 = inlined_call_operand.vmem [shape: f32[16,8], index: 15, kind: output, shape index: {}]  }
   0x1   :  { %s28_s19 = sshll.u32 %s531_s18, 4  ;;  %s507_s22 = scalar_lea.hbm %s700_s1, 256  ;;  %s29_s19 = int_to_ptr.vmem [resolvable:$true] %s28_s19 }
   0x2   :  { %p508_p0 = scmp.ne.s32.totalorder %s700_s1, %s507_s22  ;;  %p511_p1 = scmp.lt.u32.totalorder %s507_s22, %s700_s1 }
   0x4   :  { %p513_p2 = pnand %p511_p1, %p508_p0 }
   0x6   :  { %516 = shalt.err (!%p513_p2)
}
   0x7   :  { %s517_s27 = scalar_lea.vmem %s29_s19, 256  ;;  %p522_p4 = scmp.lt.s32.totalorder %s29_s19, %s29_s19 }
   0x8   :  { %p518_p3 = scmp.ne.s32.totalorder %s29_s19, %s517_s27  ;;  %p523_p5 = scmp.lt.s32.totalorder %s517_s27, %s517_s27 }
   0xa   :  { %p524_p6 = por %p523_p5, %p522_p4 }
   0xc   :  { %p525_p7 = pnand %p524_p6, %p518_p3 }
   0xe   :  { %528 = shalt.err (!%p525_p7)
}
   0xf   :  { %s532_s28 = smov 128   ;;  %s533_s29 = smov 8  }
  0x10   :  { %34 = dma.hbm_to_vmem [thread:$0]  %s700_s1, 256, %s29_s19, [#allocation3], %s532_s28, %s532_s28, %s533_s29  }
  0x11   :  { %529 = dma.done.wait [#allocation3], 256  }
  0x12   :  { %530 = vsyncadd [#allocation3], 4294967040  ;;  %vm79_vm0 = vcmask 130048   ;;  %v66_v0 = vld [vmem:[#allocation2] sm:$0xff]  ;;  %v67_v1 = vld [vmem:[#allocation2 + $0x8] sm:$0xff]  ;;  %v167_v15 = vlaneseq  ;;  %vm199_vm1 = vcmask 261120  }
  0x13   :  { %v64_v2 = vld [vmem:[%s699_s0] sm:$0xff]  ;;  %v472_v3 = vpack.c.bf16 %v67_v1, %v66_v0  ;;  %v65_v4 = vld [vmem:[%s699_s0 + $0x8] sm:$0xff]  ;;  %v186_v8 = vld [vmem:[%s706_s7 + $0x10] sm:$0xff]  ;;  %vm408_vm2 = vcmask 64512  }
  0x14   :  { %447 = vmatprep.mubr.msk.f32.mxu0 %vm79_vm0, %v64_v2  ;;  %v184_v5 = vld [vmem:[%s706_s7] sm:$0xff]  ;;  %v185_v6 = vld [vmem:[%s706_s7 + $0x8] sm:$0xff]  ;;  %v187_v9 = vld [vmem:[%s706_s7 + $0x18] sm:$0xff]  ;;  %v168_v18 = vshrl.u32 %v167_v15, 7 }
  0x15   :  { %473 = vmatprep.subr.bf16.mxu0 %v472_v3  ;;  %v476_v7 = vpack.c.bf16 %v185_v6, %v184_v5  ;;  %v480_v10 = vpack.c.bf16 %v187_v9, %v186_v8  ;;  %v72_v11 = vld [vmem:[%s705_s6] sm:$0x1]  ;;  %v305_v37 = vld [vmem:[%s712_s13 + $0x8] sm:$0xff]  ;;  %v306_v39 = vld [vmem:[%s712_s13 + $0x10] sm:$0xff] }
  0x16   :  { %475 = vmatpush3.bf16.msra.mxu0 %v472_v3  ;;  %v161_v12 = vadd.f32 1e-05, %v72_v11  ;;  %v69_v14 = vld [vmem:[%s702_s3] sm:$0x1]  ;;  %v169_v21 = vsub.s32 0, %v168_v18  ;;  %v307_v40 = vld [vmem:[%s712_s13 + $0x18] sm:$0xff] }
  0x17   :  { %477 = vmatprep.subr.bf16.mxu1 %v476_v7  ;;  %v71_v17 = vld [vmem:[%s704_s5] sm:$0x1]  ;;  %v488_v41 = vpack.c.bf16 %v307_v40, %v306_v39 }
  0x18   :  { %479 = vmatpush3.bf16.msra.mxu1 %v476_v7  ;;  %495 = vrsqrt.f32 %v161_v12  ;;  %v70_v20 = vld [vmem:[%s703_s4] sm:$0x1] }
  0x19   :  { %448 = vmatmul.mubr.msk.f32.vlgmr.msra.gmra.mrb[0].mxu0 %vm79_vm0, %v65_v4  ;;  %481 = vmatprep.subr.bf16.mxu1 %v480_v10  ;;  %v416_v23 = vld [vmem:[%s701_s2] ss:$0 sm:$0xff] }
  0x1a   :  { %v304_v36 = vld [vmem:[%s712_s13] sm:$0xff] }
  0x1b   :  { %v484_v38 = vpack.c.bf16 %v305_v37, %v304_v36  ;;  %v192_v42 = vld [vmem:[%s711_s12] sm:$0x1] }
  0x1c   :  { %483 = vmatpush3.bf16.msra.mxu1 %v480_v10  ;;  %v281_v43 = vadd.f32 1e-05, %v192_v42  ;;  %v189_v45 = vld [vmem:[%s708_s9] sm:$0x1] }
  0x1d   :  { %485 = vmatprep.subr.bf16.mxu0 %v484_v38  ;;  %v191_v47 = vld [vmem:[%s710_s11] sm:$0x1] }
  0x1e   :  { %487 = vmatpush3.bf16.msra.mxu0 %v484_v38  ;;  %497 = vrsqrt.f32 %v281_v43  ;;  %v190_v49 = vld [vmem:[%s709_s10] sm:$0x1] }
  0x1f   :  { %489 = vmatprep.subr.bf16.mxu0 %v488_v41  ;;  %v419_v51 = vld [vmem:[%s707_s8] ss:$0 sm:$0xff] }
  0x20   :  { %v422_v0 = vld [vmem:[%s713_s14] ss:$0 sm:$0xff] }
  0x22   :  { %v496_v13 = vpop.eup %495  ;;  %491 = vmatpush3.bf16.msra.mxu0 %v488_v41 }
  0x23   :  { %v163_v16 = vmul.f32 %v496_v13, %v69_v14 }
  0x25   :  { %v164_v19 = vmul.f32 %v163_v16, %v71_v17  ;;  %v170_v24 = vrot.slane %v163_v16, %v169_v21 }
  0x27   :  { %v165_v22 = vsub.f32 %v70_v20, %v164_v19 }
  0x28   :  { %v498_v44 = vpop.eup %497 }
  0x29   :  { %v178_v28 = vrot.slane %v165_v22, %v169_v21  ;;  %v283_v46 = vmul.f32 %v498_v44, %v189_v45 }
  0x2b   :  { %v284_v48 = vmul.f32 %v283_v46, %v191_v47  ;;  %v290_v52 = vrot.slane %v283_v46, %v169_v21 }
  0x2d   :  { %v285_v50 = vsub.f32 %v190_v49, %v284_v48 }
  0x2f   :  { %v298_v55 = vrot.slane %v285_v50, %v169_v21 }
  0xec   :  { %v449_v25 = vpop.f32.mrb[0].mxu0 }
  0xed   :  { %v158_v26 = vadd.f32 %v449_v25, %v416_v23  ;;  %v152_v27 = vpop.f32.mrb[1].mxu0 }
  0xee   :  { %v153_v29 = vadd.f32 %v416_v23, %v152_v27 }
  0xef   :  { %v173_v30 = vmul.f32 %v170_v24, %v158_v26 }
  0xf0   :  { %v172_v31 = vmul.f32 %v170_v24, %v153_v29 }
  0xf1   :  { %v181_v32 = vadd.f32 %v178_v28, %v173_v30 }
  0xf2   :  { %v180_v33 = vadd.f32 %v178_v28, %v172_v31 }
  0xf3   :  { %v183_v35 = vmax.f32 %v181_v32, 0.0 }
  0xf4   :  { %v182_v34 = vmax.f32 %v180_v33, 0.0 }
  0xf6   :  { %458 = vmatprep.mubr.msk.f32.mxu1 %vm199_vm1, %v182_v34 }
  0xf7   :  { %459 = vmatmul.mubr.msk.f32.vlgmr.msra.gmra.mrb[0].mxu1 %vm199_vm1, %v183_v35 }
 0x1ca   :  { %v460_v53 = vpop.f32.mrb[0].mxu1 }
 0x1cb   :  { %v278_v54 = vadd.f32 %v460_v53, %v419_v51  ;;  %v272_v56 = vpop.f32.mrb[1].mxu1 }
 0x1cc   :  { %v273_v57 = vadd.f32 %v419_v51, %v272_v56 }
 0x1cd   :  { %v293_v58 = vmul.f32 %v290_v52, %v278_v54 }
 0x1ce   :  { %v292_v59 = vmul.f32 %v290_v52, %v273_v57 }
 0x1cf   :  { %v301_v60 = vadd.f32 %v298_v55, %v293_v58 }
 0x1d0   :  { %v300_v61 = vadd.f32 %v298_v55, %v292_v59 }
 0x1d1   :  { %v303_v63 = vmax.f32 %v301_v60, 0.0 }
 0x1d2   :  { %v302_v62 = vmax.f32 %v300_v61, 0.0 }
 0x1d4   :  { %469 = vmatprep.mubr.msk.f32.mxu0 %vm199_vm1, %v302_v62 }
 0x1d5   :  { %470 = vmatmul.mubr.msk.f32.vlgmr.msra.gmra.mrb[2].mxu0 %vm199_vm1, %v303_v63 }
 0x2a8   :  { %v471_v1 = vpop.f32.mrb[2].mxu0 }
 0x2a9   :  { %v393_v2 = vadd.f32 %v471_v1, %v422_v0  ;;  %v387_v3 = vpop.f32.mrb[3].mxu0 }
 0x2aa   :  { %v388_v4 = vadd.f32 %v422_v0, %v387_v3 }
 0x2ab   :  { %v426_v5 = vmul.f32 -1.442695, %v393_v2 }
 0x2ac   :  { %v425_v6 = vmul.f32 -1.442695, %v388_v4 }
 0x2ad   :  { %499 = vpow2.f32 %v426_v5 }
 0x2ae   :  { %501 = vpow2.f32 %v425_v6 }
 0x2b7   :  { %v500_v7 = vpop.eup %499 }
 0x2b8   :  { %v502_v8 = vpop.eup %501  ;;  %v403_v9 = vadd.f32 1.0, %v500_v7 }
 0x2b9   :  { %v402_v10 = vadd.f32 1.0, %v502_v8 }
 0x2ba   :  { %503 = vrcp.f32 %v403_v9 }
 0x2bb   :  { %505 = vrcp.f32 %v402_v10 }
 0x2c4   :  { %v504_v11 = vpop.eup %503 }
 0x2c5   :  { %v506_v12 = vpop.eup %505  ;;  %410 = vst.msk [vmem:[%s714_s15 + $0x8] sm:$0xff] %vm408_vm2, %v504_v11 }
 0x2c6   :  { %409 = vst.msk [vmem:[%s714_s15] sm:$0xff] %vm408_vm2, %v506_v12 }
 0x2c7   :  { %415 = vsyncpa [#allocation3], 1 }

</bundles_post_ra>
